<compile_context>
chip_gen: v7x
topology: tpu7x:2x2x1
jax: 0.10.0
libtpu: 0.0.40
codegen_flags: <defaults>
</compile_context>

<pallas_src>
import math

import jax
import jax.numpy as jnp
from jax import lax
from jax.experimental import pallas as pl
from jax.experimental.pallas import tpu as pltpu


def _bigru_kernel(x_ref, wih_ref, whh_ref, b_in_ref, b_hn_ref, out_ref, gi_ref):
    """Fused bidirectional GRU over one batch block.

    x_ref:    (T, Bb, 2D) bf16  [x_t | x_{T-1-t}] time-major (bwd copy time-reversed)
    wih_ref:  (2D, 6H)    bf16  per gate g (r|z|n) block-diag input weights at
                                columns [g*2H, (g+1)*2H): [[Wihf_g.T, 0],[0, Wihb_g.T]]
    whh_ref:  (2H, 6H)    bf16  fused recurrent weights, same gate-major layout
    b_in_ref: (1, 6H)     f32   folded biases: b_ih (all gates) + b_hh for r, z
    b_hn_ref: (1, 2H)     f32   recurrent bias of the n gate (applied inside r*(...))
    out_ref:  (T, Bb, 2H) f32   fused [h_fwd(t) | h_bwd(loop index t)]; the wrapper
                                un-reverses the backward half along T
    gi_ref:   (T, Bb, 6H) f32   VMEM scratch: precomputed input projections
    """
    T, Bb, _ = x_ref.shape
    H6 = gi_ref.shape[-1]
    H2 = H6 // 3

    # ---- Prologue (off the serial path): one fused input-projection matmul -----
    # over all T*Bb rows, all 3 gates and both directions at once; the r/z bias
    # slots already carry the folded recurrent biases.
    x2 = x_ref[...].reshape(T * Bb, x_ref.shape[-1])
    gi = jnp.dot(x2, wih_ref[...], preferred_element_type=jnp.float32)
    gi_ref[...] = gi.reshape(T, Bb, H6) + b_in_ref[...]

    whh = whh_ref[...]          # (2H, 6H): single recurrent weight push per step
    b_hn = b_hn_ref[...]        # (1, 2H)

    # ---- Serial recurrence: one MXU matmul + one full-width store per step. ----
    def step(t, h):
        # h: (Bb, 2H) f32 fused state [h_f | h_b], carried in vregs.
        hb = h.astype(jnp.bfloat16)
        gh = jnp.dot(hb, whh, preferred_element_type=jnp.float32)   # (Bb, 6H)
        gi_t = gi_ref[t]                                            # one contiguous load
        r = jax.nn.sigmoid(gi_t[:, 0:H2] + gh[:, 0:H2])
        z = jax.nn.sigmoid(gi_t[:, H2:2 * H2] + gh[:, H2:2 * H2])
        n = jnp.tanh(gi_t[:, 2 * H2:] + r * (gh[:, 2 * H2:] + b_hn))
        h_new = (1.0 - z) * n + z * h
        out_ref[t] = h_new.astype(out_ref.dtype)     # single full-width store
        return h_new

    lax.fori_loop(0, T, step, jnp.zeros((Bb, H2), jnp.float32), unroll=min(8, T))


def _pick_batch_block(B, max_bb=128):
    """Sublane-aligned divisor of B, capped at 128 (MXU M fill on v5e/v6e), and
    kept small enough that the grid has >= 2 blocks when B allows it so both
    TensorCores of a v7x chip get work via dimension_semantics=("parallel",)."""
    if B % 8 != 0:
        return B              # small / odd batch: single block covering the batch
    cap = min(max_bb, B // 2) if B >= 16 else min(max_bb, B)
    cap = max(8, (cap // 8) * 8)
    for cand in range(cap, 7, -8):
        if B % cand == 0:
            return cand
    return 8


def _vmem_capacity_bytes():
    try:
        return int(pltpu.get_tpu_info().vmem_capacity_bytes)
    except Exception:
        return 64 * 1024 * 1024   # conservative default (v7x per-TensorCore VMEM)


def gru_encoding_pallas(inputs, packed, return_cls=False):
    """inputs: (B, T, D) float32. Returns (B, T, 2H) (and (B, 2H) if return_cls)."""
    B, T, D = inputs.shape
    wih, whh, b_in, b_hn = packed["wih"], packed["whh"], packed["b_in"], packed["b_hn"]
    H2 = whh.shape[0]
    H = H2 // 2
    assert wih.shape == (2 * D, 3 * H2)

    # Time-major; append a time-reversed copy along features so the backward
    # direction's input projection comes out time-aligned from the same block-diag
    # matmul with no in-kernel flip.
    # TODO(synk): this doubles x HBM traffic / VMEM (2D vs D); negligible at D=32,
    # revisit with dense per-direction weights + in-kernel reversal once D, H >= 128.
    x_tm = jnp.transpose(inputs, (1, 0, 2)).astype(jnp.bfloat16)       # (T, B, D)
    x_pair = jnp.concatenate([x_tm, x_tm[::-1]], axis=-1)              # (T, B, 2D)

    Bb = _pick_batch_block(B)
    grid = (B // Bb,)

    # VMEM budget: double-buffered x/out blocks + weights + gi scratch, with 1.5x
    # margin, clamped to this generation's physical per-core capacity.
    block_bytes = (2 * T * Bb * 2 * D * 2             # x block (bf16) x 2 buffers
                   + 2 * T * Bb * H2 * 4              # out block (f32) x 2 buffers
                   + 2 * (wih.size + whh.size) * 2    # weights (bf16) x 2 buffers
                   + (b_in.size + b_hn.size) * 4
                   + T * Bb * 3 * H2 * 4)             # gi scratch (f32)
    cap = _vmem_capacity_bytes()
    vmem_limit = int(min(max(block_bytes + block_bytes // 2, 32 * 1024 * 1024),
                         (cap * 7) // 8))

    out_tm = pl.pallas_call(
        _bigru_kernel,
        out_shape=jax.ShapeDtypeStruct((T, B, H2), jnp.float32),
        grid=grid,
        in_specs=[
            pl.BlockSpec((T, Bb, 2 * D), lambda i: (0, i, 0)),
            pl.BlockSpec(wih.shape, lambda i: (0, 0)),
            pl.BlockSpec(whh.shape, lambda i: (0, 0)),
            pl.BlockSpec(b_in.shape, lambda i: (0, 0)),
            pl.BlockSpec(b_hn.shape, lambda i: (0, 0)),
        ],
        out_specs=pl.BlockSpec((T, Bb, H2), lambda i: (0, i, 0)),
        scratch_shapes=[
            pltpu.VMEM((T, Bb, 3 * H2), jnp.float32),   # fused gi (all gates, both dirs)
        ],
        compiler_params=pltpu.CompilerParams(
            dimension_semantics=("parallel",),
            vmem_limit_bytes=vmem_limit,
        ),
    )(x_pair, wih, whh, b_in, b_hn)

    # Forward half is already time-aligned; the backward half was written at loop
    # index t and belongs to timestep T-1-t -> un-reverse once here (single XLA
    # pass off the serial path), then one transpose back to batch-major.
    fused = jnp.concatenate([out_tm[:, :, :H], out_tm[::-1, :, H:]], axis=-1)
    outputs = jnp.transpose(fused, (1, 0, 2))            # (B, T, 2H)
    if return_cls:
        # hidden = cat([h_forward_final, h_backward_final], -1)
        hidden = jnp.concatenate([outputs[:, -1, :H], outputs[:, 0, H:]], axis=-1)
        return outputs, hidden
    return outputs


def init_params(key, input_dim, hidden_per_dir):
    """torch.nn.GRU-layout parameters, uniform(-k, k) with k = 1/sqrt(H)."""
    H, D = hidden_per_dir, input_dim
    k = 1.0 / math.sqrt(H)
    keys = jax.random.split(key, 8)
    u = lambda kk, shape: jax.random.uniform(kk, shape, jnp.float32, -k, k)
    return {
        "w_ih_f": u(keys[0], (3 * H, D)), "w_hh_f": u(keys[1], (3 * H, H)),
        "b_ih_f": u(keys[2], (3 * H,)),   "b_hh_f": u(keys[3], (3 * H,)),
        "w_ih_b": u(keys[4], (3 * H, D)), "w_hh_b": u(keys[5], (3 * H, H)),
        "b_ih_b": u(keys[6], (3 * H,)),   "b_hh_b": u(keys[7], (3 * H,)),
    }


def pack_params(raw, compute_dtype=jnp.bfloat16):
    """Pack torch-layout GRU params into the fused kernel layout.

    wih:  (2D, 6H) gate-major block-diag input weights    (bf16)
    whh:  (2H, 6H) gate-major block-diag recurrent weights (bf16)
    b_in: (1, 6H)  b_ih (+ folded b_hh for the r and z gates)  (f32)
    b_hn: (1, 2H)  b_hh of the n gate, applied inside r * (...) (f32)
    NOTE: correctness relies on the off-diagonal direction blocks staying zero.
    """
    H = raw["w_hh_f"].shape[1]
    D = raw["w_ih_f"].shape[1]
    H2 = 2 * H
    gate = lambda w, g: w[g * H:(g + 1) * H]

    wih = jnp.zeros((2 * D, 3 * H2), jnp.float32)
    whh = jnp.zeros((H2, 3 * H2), jnp.float32)
    b_in = jnp.zeros((1, 3 * H2), jnp.float32)
    for g in range(3):
        c0 = g * H2
        wih = wih.at[:D, c0:c0 + H].set(gate(raw["w_ih_f"], g).T)
        wih = wih.at[D:, c0 + H:c0 + H2].set(gate(raw["w_ih_b"], g).T)
        whh = whh.at[:H, c0:c0 + H].set(gate(raw["w_hh_f"], g).T)
        whh = whh.at[H:, c0 + H:c0 + H2].set(gate(raw["w_hh_b"], g).T)
        bf = gate(raw["b_ih_f"], g) + (gate(raw["b_hh_f"], g) if g < 2 else 0.0)
        bb = gate(raw["b_ih_b"], g) + (gate(raw["b_hh_b"], g) if g < 2 else 0.0)
        b_in = b_in.at[0, c0:c0 + H].set(bf)
        b_in = b_in.at[0, c0 + H:c0 + H2].set(bb)
    b_hn = jnp.concatenate([gate(raw["b_hh_f"], 2), gate(raw["b_hh_b"], 2)])[None, :]
    return {"wih": wih.astype(compute_dtype), "whh": whh.astype(compute_dtype),
            "b_in": b_in, "b_hn": b_hn}


def gru_encoding_reference(inputs, raw):
    """Pure-JAX f32 reference (lax.scan) from the torch-layout parameters."""
    B, T, D = inputs.shape
    H = raw["w_hh_f"].shape[1]
    x = inputs.astype(jnp.float32)

    def run(w_ih, w_hh, b_ih, b_hh, reverse):
        wih, whh = w_ih.T, w_hh.T              # (D, 3H), (H, 3H)

        def cell(h, x_t):
            gi = x_t @ wih + b_ih
            gh = h @ whh + b_hh
            r = jax.nn.sigmoid(gi[:, :H] + gh[:, :H])
            z = jax.nn.sigmoid(gi[:, H:2 * H] + gh[:, H:2 * H])
            n = jnp.tanh(gi[:, 2 * H:] + r * gh[:, 2 * H:])
            h_new = (1.0 - z) * n + z * h
            return h_new, h_new

        xs = jnp.transpose(x, (1, 0, 2))
        _, ys = lax.scan(cell, jnp.zeros((B, H), jnp.float32), xs, reverse=reverse)
        return jnp.transpose(ys, (1, 0, 2))

    out_f = run(raw["w_ih_f"], raw["w_hh_f"], raw["b_ih_f"], raw["b_hh_f"], False)
    out_b = run(raw["w_ih_b"], raw["w_hh_b"], raw["b_ih_b"], raw["b_hh_b"], True)
    return jnp.concatenate([out_f, out_b], axis=-1)


if __name__ == "__main__":
    # config.hidden_dim = 32 -> per-direction hidden H = 16; input_dim defaults to hidden_dim.
    B, T, hidden_dim = 2, 8, 32
    H = hidden_dim // 2
    D = hidden_dim

    key = jax.random.PRNGKey(0)
    k_x, k_p = jax.random.split(key)
    inputs = jax.random.normal(k_x, (B, T, D), jnp.float32)
    raw = init_params(k_p, D, H)
    packed = pack_params(raw)

    outputs, hidden = gru_encoding_pallas(inputs, packed, return_cls=True)
    outputs = jax.block_until_ready(outputs)

    ref = gru_encoding_reference(inputs, raw)
    ref_hidden = jnp.concatenate([ref[:, -1, :H], ref[:, 0, H:]], axis=-1)

    assert outputs.shape == (B, T, hidden_dim), outputs.shape
    assert hidden.shape == (B, hidden_dim), hidden.shape
    # bf16 MXU inputs (f32 state / accumulation) -> loosened tolerance vs f32 reference.
    max_err = float(jnp.max(jnp.abs(outputs - ref)))
    assert jnp.allclose(outputs, ref, atol=5e-2, rtol=5e-2), f"max_err={max_err}"
    assert jnp.allclose(hidden, ref_hidden, atol=5e-2, rtol=5e-2)

    # TODO(synk): pack_padded_sequence path (mask/lens sorting) not implemented;
    # only the mask=None / lens=None branch of GRUEncoding.forward is covered.
    print("KERNEL_OK")
</pallas_src>

<mosaic_0001>
module attributes {stable_mosaic.version = 11 : i64} {
  func.func @_bigru_kernel(%arg0: i32, %arg1: memref<8x2x64xbf16, #tpu.memory_space<vmem>>, %arg2: memref<64x96xbf16, #tpu.memory_space<vmem>>, %arg3: memref<32x96xbf16, #tpu.memory_space<vmem>>, %arg4: memref<1x96xf32, #tpu.memory_space<vmem>>, %arg5: memref<1x32xf32, #tpu.memory_space<vmem>>, %arg6: memref<8x2x32xf32, #tpu.memory_space<vmem>>, %arg7: memref<8x2x96xf32, #tpu.memory_space<vmem>>) attributes {dimension_semantics = [#tpu.dimension_semantics<parallel>], iteration_bounds = array<i64: 1>, scalar_prefetch = 0 : i64, scratch_operands = 1 : i64, tpu.core_type = #tpu.core_type<tc>, window_params = [{transform_indices = @transform_0, window_bounds = array<i64: 8, 2, 64>}, {pipeline_mode = #tpu.pipeline_mode<synchronous>, transform_indices = @transform_1, window_bounds = array<i64: 64, 96>}, {pipeline_mode = #tpu.pipeline_mode<synchronous>, transform_indices = @transform_2, window_bounds = array<i64: 32, 96>}, {pipeline_mode = #tpu.pipeline_mode<synchronous>, transform_indices = @transform_3, window_bounds = array<i64: 1, 96>}, {pipeline_mode = #tpu.pipeline_mode<synchronous>, transform_indices = @transform_4, window_bounds = array<i64: 1, 32>}, {transform_indices = @transform_5, window_bounds = array<i64: 8, 2, 32>}]} {
    %c0 = arith.constant 0 : index
    %c0_0 = arith.constant 0 : index
    %c0_1 = arith.constant 0 : index
    %0 = vector.load %arg1[%c0, %c0_0, %c0_1] : memref<8x2x64xbf16, #tpu.memory_space<vmem>>, vector<8x2x64xbf16>
    %1 = vector.shape_cast %0 : vector<8x2x64xbf16> to vector<16x64xbf16>
    %c0_2 = arith.constant 0 : index
    %c0_3 = arith.constant 0 : index
    %2 = vector.load %arg2[%c0_2, %c0_3] : memref<64x96xbf16, #tpu.memory_space<vmem>>, vector<64x96xbf16>
    %cst = arith.constant dense<0.000000e+00> : vector<16x96xf32>
    %3 = tpu.matmul %1, %2, %cst {dimension_numbers = #tpu.dot_dimension_numbers<[1], [0], [0], [1], [0, 0, 1, 1], [], []>} : vector<16x64xbf16>, vector<64x96xbf16>, vector<16x96xf32> -> vector<16x96xf32>
    %4 = vector.shape_cast %3 : vector<16x96xf32> to vector<8x2x96xf32>
    %c0_4 = arith.constant 0 : index
    %c0_5 = arith.constant 0 : index
    %5 = vector.load %arg4[%c0_4, %c0_5] : memref<1x96xf32, #tpu.memory_space<vmem>>, vector<1x96xf32>
    %6 = vector.shape_cast %5 : vector<1x96xf32> to vector<1x1x96xf32>
    %7 = vector.broadcast %6 : vector<1x1x96xf32> to vector<8x2x96xf32>
    %8 = arith.addf %4, %7 : vector<8x2x96xf32>
    %c0_6 = arith.constant 0 : index
    %c0_7 = arith.constant 0 : index
    %c0_8 = arith.constant 0 : index
    %9 = vector.load %arg7[%c0_6, %c0_7, %c0_8] : memref<8x2x96xf32, #tpu.memory_space<vmem>>, vector<8x2x96xf32>
    tpu.vector_store %arg7[%c0_6, %c0_7, %c0_8], %8 {strides = array<i32>} : memref<8x2x96xf32, #tpu.memory_space<vmem>>, vector<8x2x96xf32>,
    %c0_9 = arith.constant 0 : index
    %c0_10 = arith.constant 0 : index
    %10 = vector.load %arg3[%c0_9, %c0_10] : memref<32x96xbf16, #tpu.memory_space<vmem>>, vector<32x96xbf16>
    %c0_11 = arith.constant 0 : index
    %c0_12 = arith.constant 0 : index
    %11 = vector.load %arg5[%c0_11, %c0_12] : memref<1x32xf32, #tpu.memory_space<vmem>>, vector<1x32xf32>
    %cst_13 = arith.constant 0.000000e+00 : f32
    %12 = vector.broadcast %cst_13 : f32 to vector<2x32xf32>
    %c0_i32 = arith.constant 0 : i32
    %13 = arith.truncf %12 : vector<2x32xf32> to vector<2x32xbf16>
    %cst_14 = arith.constant dense<0.000000e+00> : vector<2x96xf32>
    %14 = tpu.matmul %13, %10, %cst_14 {dimension_numbers = #tpu.dot_dimension_numbers<[1], [0], [0], [1], [0, 0, 1, 1], [], []>} : vector<2x32xbf16>, vector<32x96xbf16>, vector<2x96xf32> -> vector<2x96xf32>
    %15 = arith.index_cast %c0_i32 : i32 to index
    %c0_15 = arith.constant 0 : index
    %c0_16 = arith.constant 0 : index
    %16 = vector.load %arg7[%15, %c0_15, %c0_16] : memref<8x2x96xf32, #tpu.memory_space<vmem>>, vector<1x2x96xf32>
    %17 = vector.shape_cast %16 : vector<1x2x96xf32> to vector<2x96xf32>
    %18 = vector.extract_strided_slice %17 {offsets = [0, 0], sizes = [2, 32], strides = [1, 1]} : vector<2x96xf32> to vector<2x32xf32>
    %19 = vector.extract_strided_slice %14 {offsets = [0, 0], sizes = [2, 32], strides = [1, 1]} : vector<2x96xf32> to vector<2x32xf32>
    %20 = arith.addf %18, %19 : vector<2x32xf32>
    %21 = arith.negf %20 : vector<2x32xf32>
    %22 = math.exp %21 : vector<2x32xf32>
    %cst_17 = arith.constant 1.000000e+00 : f32
    %23 = vector.broadcast %cst_17 : f32 to vector<2x32xf32>
    %24 = arith.addf %23, %22 : vector<2x32xf32>
    %25 = arith.divf %23, %24 : vector<2x32xf32>
    %26 = vector.extract_strided_slice %17 {offsets = [0, 32], sizes = [2, 32], strides = [1, 1]} : vector<2x96xf32> to vector<2x32xf32>
    %27 = vector.extract_strided_slice %14 {offsets = [0, 32], sizes = [2, 32], strides = [1, 1]} : vector<2x96xf32> to vector<2x32xf32>
    %28 = arith.addf %26, %27 : vector<2x32xf32>
    %29 = arith.negf %28 : vector<2x32xf32>
    %30 = math.exp %29 : vector<2x32xf32>
    %cst_18 = arith.constant 1.000000e+00 : f32
    %31 = vector.broadcast %cst_18 : f32 to vector<2x32xf32>
    %32 = arith.addf %31, %30 : vector<2x32xf32>
    %33 = arith.divf %31, %32 : vector<2x32xf32>
    %34 = vector.extract_strided_slice %17 {offsets = [0, 64], sizes = [2, 32], strides = [1, 1]} : vector<2x96xf32> to vector<2x32xf32>
    %35 = vector.extract_strided_slice %14 {offsets = [0, 64], sizes = [2, 32], strides = [1, 1]} : vector<2x96xf32> to vector<2x32xf32>
    %36 = vector.broadcast %11 : vector<1x32xf32> to vector<2x32xf32>
    %37 = arith.addf %35, %36 : vector<2x32xf32>
    %38 = arith.mulf %25, %37 : vector<2x32xf32>
    %39 = arith.addf %34, %38 : vector<2x32xf32>
    %40 = math.tanh %39 : vector<2x32xf32>
    %cst_19 = arith.constant 1.000000e+00 : f32
    %41 = vector.broadcast %cst_19 : f32 to vector<2x32xf32>
    %42 = arith.subf %41, %33 : vector<2x32xf32>
    %43 = arith.mulf %42, %40 : vector<2x32xf32>
    %44 = arith.mulf %33, %12 : vector<2x32xf32>
    %45 = arith.addf %43, %44 : vector<2x32xf32>
    %46 = arith.index_cast %c0_i32 : i32 to index
    %c0_20 = arith.constant 0 : index
    %c0_21 = arith.constant 0 : index
    %47 = vector.load %arg6[%46, %c0_20, %c0_21] : memref<8x2x32xf32, #tpu.memory_space<vmem>>, vector<1x2x32xf32>
    %48 = vector.shape_cast %47 : vector<1x2x32xf32> to vector<2x32xf32>
    %49 = vector.shape_cast %45 : vector<2x32xf32> to vector<1x2x32xf32>
    tpu.vector_store %arg6[%46, %c0_20, %c0_21], %49 {strides = array<i32>} : memref<8x2x32xf32, #tpu.memory_space<vmem>>, vector<1x2x32xf32>,
    %c1_i32 = arith.constant 1 : i32
    %50 = arith.truncf %45 : vector<2x32xf32> to vector<2x32xbf16>
    %cst_22 = arith.constant dense<0.000000e+00> : vector<2x96xf32>
    %51 = tpu.matmul %50, %10, %cst_22 {dimension_numbers = #tpu.dot_dimension_numbers<[1], [0], [0], [1], [0, 0, 1, 1], [], []>} : vector<2x32xbf16>, vector<32x96xbf16>, vector<2x96xf32> -> vector<2x96xf32>
    %52 = arith.index_cast %c1_i32 : i32 to index
    %c0_23 = arith.constant 0 : index
    %c0_24 = arith.constant 0 : index
    %53 = vector.load %arg7[%52, %c0_23, %c0_24] : memref<8x2x96xf32, #tpu.memory_space<vmem>>, vector<1x2x96xf32>
    %54 = vector.shape_cast %53 : vector<1x2x96xf32> to vector<2x96xf32>
    %55 = vector.extract_strided_slice %54 {offsets = [0, 0], sizes = [2, 32], strides = [1, 1]} : vector<2x96xf32> to vector<2x32xf32>
    %56 = vector.extract_strided_slice %51 {offsets = [0, 0], sizes = [2, 32], strides = [1, 1]} : vector<2x96xf32> to vector<2x32xf32>
    %57 = arith.addf %55, %56 : vector<2x32xf32>
    %58 = arith.negf %57 : vector<2x32xf32>
    %59 = math.exp %58 : vector<2x32xf32>
    %cst_25 = arith.constant 1.000000e+00 : f32
    %60 = vector.broadcast %cst_25 : f32 to vector<2x32xf32>
    %61 = arith.addf %60, %59 : vector<2x32xf32>
    %62 = arith.divf %60, %61 : vector<2x32xf32>
    %63 = vector.extract_strided_slice %54 {offsets = [0, 32], sizes = [2, 32], strides = [1, 1]} : vector<2x96xf32> to vector<2x32xf32>
    %64 = vector.extract_strided_slice %51 {offsets = [0, 32], sizes = [2, 32], strides = [1, 1]} : vector<2x96xf32> to vector<2x32xf32>
    %65 = arith.addf %63, %64 : vector<2x32xf32>
    %66 = arith.negf %65 : vector<2x32xf32>
    %67 = math.exp %66 : vector<2x32xf32>
    %cst_26 = arith.constant 1.000000e+00 : f32
    %68 = vector.broadcast %cst_26 : f32 to vector<2x32xf32>
    %69 = arith.addf %68, %67 : vector<2x32xf32>
    %70 = arith.divf %68, %69 : vector<2x32xf32>
    %71 = vector.extract_strided_slice %54 {offsets = [0, 64], sizes = [2, 32], strides = [1, 1]} : vector<2x96xf32> to vector<2x32xf32>
    %72 = vector.extract_strided_slice %51 {offsets = [0, 64], sizes = [2, 32], strides = [1, 1]} : vector<2x96xf32> to vector<2x32xf32>
    %73 = vector.broadcast %11 : vector<1x32xf32> to vector<2x32xf32>
    %74 = arith.addf %72, %73 : vector<2x32xf32>
    %75 = arith.mulf %62, %74 : vector<2x32xf32>
    %76 = arith.addf %71, %75 : vector<2x32xf32>
    %77 = math.tanh %76 : vector<2x32xf32>
    %cst_27 = arith.constant 1.000000e+00 : f32
    %78 = vector.broadcast %cst_27 : f32 to vector<2x32xf32>
    %79 = arith.subf %78, %70 : vector<2x32xf32>
    %80 = arith.mulf %79, %77 : vector<2x32xf32>
    %81 = arith.mulf %70, %45 : vector<2x32xf32>
    %82 = arith.addf %80, %81 : vector<2x32xf32>
    %83 = arith.index_cast %c1_i32 : i32 to index
    %c0_28 = arith.constant 0 : index
    %c0_29 = arith.constant 0 : index
    %84 = vector.load %arg6[%83, %c0_28, %c0_29] : memref<8x2x32xf32, #tpu.memory_space<vmem>>, vector<1x2x32xf32>
    %85 = vector.shape_cast %84 : vector<1x2x32xf32> to vector<2x32xf32>
    %86 = vector.shape_cast %82 : vector<2x32xf32> to vector<1x2x32xf32>
    tpu.vector_store %arg6[%83, %c0_28, %c0_29], %86 {strides = array<i32>} : memref<8x2x32xf32, #tpu.memory_space<vmem>>, vector<1x2x32xf32>,
    %c2_i32 = arith.constant 2 : i32
    %87 = arith.truncf %82 : vector<2x32xf32> to vector<2x32xbf16>
    %cst_30 = arith.constant dense<0.000000e+00> : vector<2x96xf32>
    %88 = tpu.matmul %87, %10, %cst_30 {dimension_numbers = #tpu.dot_dimension_numbers<[1], [0], [0], [1], [0, 0, 1, 1], [], []>} : vector<2x32xbf16>, vector<32x96xbf16>, vector<2x96xf32> -> vector<2x96xf32>
    %89 = arith.index_cast %c2_i32 : i32 to index
    %c0_31 = arith.constant 0 : index
    %c0_32 = arith.constant 0 : index
    %90 = vector.load %arg7[%89, %c0_31, %c0_32] : memref<8x2x96xf32, #tpu.memory_space<vmem>>, vector<1x2x96xf32>
    %91 = vector.shape_cast %90 : vector<1x2x96xf32> to vector<2x96xf32>
    %92 = vector.extract_strided_slice %91 {offsets = [0, 0], sizes = [2, 32], strides = [1, 1]} : vector<2x96xf32> to vector<2x32xf32>
    %93 = vector.extract_strided_slice %88 {offsets = [0, 0], sizes = [2, 32], strides = [1, 1]} : vector<2x96xf32> to vector<2x32xf32>
    %94 = arith.addf %92, %93 : vector<2x32xf32>
    %95 = arith.negf %94 : vector<2x32xf32>
    %96 = math.exp %95 : vector<2x32xf32>
    %cst_33 = arith.constant 1.000000e+00 : f32
    %97 = vector.broadcast %cst_33 : f32 to vector<2x32xf32>
    %98 = arith.addf %97, %96 : vector<2x32xf32>
    %99 = arith.divf %97, %98 : vector<2x32xf32>
    %100 = vector.extract_strided_slice %91 {offsets = [0, 32], sizes = [2, 32], strides = [1, 1]} : vector<2x96xf32> to vector<2x32xf32>
    %101 = vector.extract_strided_slice %88 {offsets = [0, 32], sizes = [2, 32], strides = [1, 1]} : vector<2x96xf32> to vector<2x32xf32>
    %102 = arith.addf %100, %101 : vector<2x32xf32>
    %103 = arith.negf %102 : vector<2x32xf32>
    %104 = math.exp %103 : vector<2x32xf32>
    %cst_34 = arith.constant 1.000000e+00 : f32
    %105 = vector.broadcast %cst_34 : f32 to vector<2x32xf32>
    %106 = arith.addf %105, %104 : vector<2x32xf32>
    %107 = arith.divf %105, %106 : vector<2x32xf32>
    %108 = vector.extract_strided_slice %91 {offsets = [0, 64], sizes = [2, 32], strides = [1, 1]} : vector<2x96xf32> to vector<2x32xf32>
    %109 = vector.extract_strided_slice %88 {offsets = [0, 64], sizes = [2, 32], strides = [1, 1]} : vector<2x96xf32> to vector<2x32xf32>
    %110 = vector.broadcast %11 : vector<1x32xf32> to vector<2x32xf32>
    %111 = arith.addf %109, %110 : vector<2x32xf32>
    %112 = arith.mulf %99, %111 : vector<2x32xf32>
    %113 = arith.addf %108, %112 : vector<2x32xf32>
    %114 = math.tanh %113 : vector<2x32xf32>
    %cst_35 = arith.constant 1.000000e+00 : f32
    %115 = vector.broadcast %cst_35 : f32 to vector<2x32xf32>
    %116 = arith.subf %115, %107 : vector<2x32xf32>
    %117 = arith.mulf %116, %114 : vector<2x32xf32>
    %118 = arith.mulf %107, %82 : vector<2x32xf32>
    %119 = arith.addf %117, %118 : vector<2x32xf32>
    %120 = arith.index_cast %c2_i32 : i32 to index
    %c0_36 = arith.constant 0 : index
    %c0_37 = arith.constant 0 : index
    %121 = vector.load %arg6[%120, %c0_36, %c0_37] : memref<8x2x32xf32, #tpu.memory_space<vmem>>, vector<1x2x32xf32>
    %122 = vector.shape_cast %121 : vector<1x2x32xf32> to vector<2x32xf32>
    %123 = vector.shape_cast %119 : vector<2x32xf32> to vector<1x2x32xf32>
    tpu.vector_store %arg6[%120, %c0_36, %c0_37], %123 {strides = array<i32>} : memref<8x2x32xf32, #tpu.memory_space<vmem>>, vector<1x2x32xf32>,
    %c3_i32 = arith.constant 3 : i32
    %124 = arith.truncf %119 : vector<2x32xf32> to vector<2x32xbf16>
    %cst_38 = arith.constant dense<0.000000e+00> : vector<2x96xf32>
    %125 = tpu.matmul %124, %10, %cst_38 {dimension_numbers = #tpu.dot_dimension_numbers<[1], [0], [0], [1], [0, 0, 1, 1], [], []>} : vector<2x32xbf16>, vector<32x96xbf16>, vector<2x96xf32> -> vector<2x96xf32>
    %126 = arith.index_cast %c3_i32 : i32 to index
    %c0_39 = arith.constant 0 : index
    %c0_40 = arith.constant 0 : index
    %127 = vector.load %arg7[%126, %c0_39, %c0_40] : memref<8x2x96xf32, #tpu.memory_space<vmem>>, vector<1x2x96xf32>
    %128 = vector.shape_cast %127 : vector<1x2x96xf32> to vector<2x96xf32>
    %129 = vector.extract_strided_slice %128 {offsets = [0, 0], sizes = [2, 32], strides = [1, 1]} : vector<2x96xf32> to vector<2x32xf32>
    %130 = vector.extract_strided_slice %125 {offsets = [0, 0], sizes = [2, 32], strides = [1, 1]} : vector<2x96xf32> to vector<2x32xf32>
    %131 = arith.addf %129, %130 : vector<2x32xf32>
    %132 = arith.negf %131 : vector<2x32xf32>
    %133 = math.exp %132 : vector<2x32xf32>
    %cst_41 = arith.constant 1.000000e+00 : f32
    %134 = vector.broadcast %cst_41 : f32 to vector<2x32xf32>
    %135 = arith.addf %134, %133 : vector<2x32xf32>
    %136 = arith.divf %134, %135 : vector<2x32xf32>
    %137 = vector.extract_strided_slice %128 {offsets = [0, 32], sizes = [2, 32], strides = [1, 1]} : vector<2x96xf32> to vector<2x32xf32>
    %138 = vector.extract_strided_slice %125 {offsets = [0, 32], sizes = [2, 32], strides = [1, 1]} : vector<2x96xf32> to vector<2x32xf32>
    %139 = arith.addf %137, %138 : vector<2x32xf32>
    %140 = arith.negf %139 : vector<2x32xf32>
    %141 = math.exp %140 : vector<2x32xf32>
    %cst_42 = arith.constant 1.000000e+00 : f32
    %142 = vector.broadcast %cst_42 : f32 to vector<2x32xf32>
    %143 = arith.addf %142, %141 : vector<2x32xf32>
    %144 = arith.divf %142, %143 : vector<2x32xf32>
    %145 = vector.extract_strided_slice %128 {offsets = [0, 64], sizes = [2, 32], strides = [1, 1]} : vector<2x96xf32> to vector<2x32xf32>
    %146 = vector.extract_strided_slice %125 {offsets = [0, 64], sizes = [2, 32], strides = [1, 1]} : vector<2x96xf32> to vector<2x32xf32>
    %147 = vector.broadcast %11 : vector<1x32xf32> to vector<2x32xf32>
    %148 = arith.addf %146, %147 : vector<2x32xf32>
    %149 = arith.mulf %136, %148 : vector<2x32xf32>
    %150 = arith.addf %145, %149 : vector<2x32xf32>
    %151 = math.tanh %150 : vector<2x32xf32>
    %cst_43 = arith.constant 1.000000e+00 : f32
    %152 = vector.broadcast %cst_43 : f32 to vector<2x32xf32>
    %153 = arith.subf %152, %144 : vector<2x32xf32>
    %154 = arith.mulf %153, %151 : vector<2x32xf32>
    %155 = arith.mulf %144, %119 : vector<2x32xf32>
    %156 = arith.addf %154, %155 : vector<2x32xf32>
    %157 = arith.index_cast %c3_i32 : i32 to index
    %c0_44 = arith.constant 0 : index
    %c0_45 = arith.constant 0 : index
    %158 = vector.load %arg6[%157, %c0_44, %c0_45] : memref<8x2x32xf32, #tpu.memory_space<vmem>>, vector<1x2x32xf32>
    %159 = vector.shape_cast %158 : vector<1x2x32xf32> to vector<2x32xf32>
    %160 = vector.shape_cast %156 : vector<2x32xf32> to vector<1x2x32xf32>
    tpu.vector_store %arg6[%157, %c0_44, %c0_45], %160 {strides = array<i32>} : memref<8x2x32xf32, #tpu.memory_space<vmem>>, vector<1x2x32xf32>,
    %c4_i32 = arith.constant 4 : i32
    %161 = arith.truncf %156 : vector<2x32xf32> to vector<2x32xbf16>
    %cst_46 = arith.constant dense<0.000000e+00> : vector<2x96xf32>
    %162 = tpu.matmul %161, %10, %cst_46 {dimension_numbers = #tpu.dot_dimension_numbers<[1], [0], [0], [1], [0, 0, 1, 1], [], []>} : vector<2x32xbf16>, vector<32x96xbf16>, vector<2x96xf32> -> vector<2x96xf32>
    %163 = arith.index_cast %c4_i32 : i32 to index
    %c0_47 = arith.constant 0 : index
    %c0_48 = arith.constant 0 : index
    %164 = vector.load %arg7[%163, %c0_47, %c0_48] : memref<8x2x96xf32, #tpu.memory_space<vmem>>, vector<1x2x96xf32>
    %165 = vector.shape_cast %164 : vector<1x2x96xf32> to vector<2x96xf32>
    %166 = vector.extract_strided_slice %165 {offsets = [0, 0], sizes = [2, 32], strides = [1, 1]} : vector<2x96xf32> to vector<2x32xf32>
    %167 = vector.extract_strided_slice %162 {offsets = [0, 0], sizes = [2, 32], strides = [1, 1]} : vector<2x96xf32> to vector<2x32xf32>
    %168 = arith.addf %166, %167 : vector<2x32xf32>
    %169 = arith.negf %168 : vector<2x32xf32>
    %170 = math.exp %169 : vector<2x32xf32>
    %cst_49 = arith.constant 1.000000e+00 : f32
    %171 = vector.broadcast %cst_49 : f32 to vector<2x32xf32>
    %172 = arith.addf %171, %170 : vector<2x32xf32>
    %173 = arith.divf %171, %172 : vector<2x32xf32>
    %174 = vector.extract_strided_slice %165 {offsets = [0, 32], sizes = [2, 32], strides = [1, 1]} : vector<2x96xf32> to vector<2x32xf32>
    %175 = vector.extract_strided_slice %162 {offsets = [0, 32], sizes = [2, 32], strides = [1, 1]} : vector<2x96xf32> to vector<2x32xf32>
    %176 = arith.addf %174, %175 : vector<2x32xf32>
    %177 = arith.negf %176 : vector<2x32xf32>
    %178 = math.exp %177 : vector<2x32xf32>
    %cst_50 = arith.constant 1.000000e+00 : f32
    %179 = vector.broadcast %cst_50 : f32 to vector<2x32xf32>
    %180 = arith.addf %179, %178 : vector<2x32xf32>
    %181 = arith.divf %179, %180 : vector<2x32xf32>
    %182 = vector.extract_strided_slice %165 {offsets = [0, 64], sizes = [2, 32], strides = [1, 1]} : vector<2x96xf32> to vector<2x32xf32>
    %183 = vector.extract_strided_slice %162 {offsets = [0, 64], sizes = [2, 32], strides = [1, 1]} : vector<2x96xf32> to vector<2x32xf32>
    %184 = vector.broadcast %11 : vector<1x32xf32> to vector<2x32xf32>
    %185 = arith.addf %183, %184 : vector<2x32xf32>
    %186 = arith.mulf %173, %185 : vector<2x32xf32>
    %187 = arith.addf %182, %186 : vector<2x32xf32>
    %188 = math.tanh %187 : vector<2x32xf32>
    %cst_51 = arith.constant 1.000000e+00 : f32
    %189 = vector.broadcast %cst_51 : f32 to vector<2x32xf32>
    %190 = arith.subf %189, %181 : vector<2x32xf32>
    %191 = arith.mulf %190, %188 : vector<2x32xf32>
    %192 = arith.mulf %181, %156 : vector<2x32xf32>
    %193 = arith.addf %191, %192 : vector<2x32xf32>
    %194 = arith.index_cast %c4_i32 : i32 to index
    %c0_52 = arith.constant 0 : index
    %c0_53 = arith.constant 0 : index
    %195 = vector.load %arg6[%194, %c0_52, %c0_53] : memref<8x2x32xf32, #tpu.memory_space<vmem>>, vector<1x2x32xf32>
    %196 = vector.shape_cast %195 : vector<1x2x32xf32> to vector<2x32xf32>
    %197 = vector.shape_cast %193 : vector<2x32xf32> to vector<1x2x32xf32>
    tpu.vector_store %arg6[%194, %c0_52, %c0_53], %197 {strides = array<i32>} : memref<8x2x32xf32, #tpu.memory_space<vmem>>, vector<1x2x32xf32>,
    %c5_i32 = arith.constant 5 : i32
    %198 = arith.truncf %193 : vector<2x32xf32> to vector<2x32xbf16>
    %cst_54 = arith.constant dense<0.000000e+00> : vector<2x96xf32>
    %199 = tpu.matmul %198, %10, %cst_54 {dimension_numbers = #tpu.dot_dimension_numbers<[1], [0], [0], [1], [0, 0, 1, 1], [], []>} : vector<2x32xbf16>, vector<32x96xbf16>, vector<2x96xf32> -> vector<2x96xf32>
    %200 = arith.index_cast %c5_i32 : i32 to index
    %c0_55 = arith.constant 0 : index
    %c0_56 = arith.constant 0 : index
    %201 = vector.load %arg7[%200, %c0_55, %c0_56] : memref<8x2x96xf32, #tpu.memory_space<vmem>>, vector<1x2x96xf32>
    %202 = vector.shape_cast %201 : vector<1x2x96xf32> to vector<2x96xf32>
    %203 = vector.extract_strided_slice %202 {offsets = [0, 0], sizes = [2, 32], strides = [1, 1]} : vector<2x96xf32> to vector<2x32xf32>
    %204 = vector.extract_strided_slice %199 {offsets = [0, 0], sizes = [2, 32], strides = [1, 1]} : vector<2x96xf32> to vector<2x32xf32>
    %205 = arith.addf %203, %204 : vector<2x32xf32>
    %206 = arith.negf %205 : vector<2x32xf32>
    %207 = math.exp %206 : vector<2x32xf32>
    %cst_57 = arith.constant 1.000000e+00 : f32
    %208 = vector.broadcast %cst_57 : f32 to vector<2x32xf32>
    %209 = arith.addf %208, %207 : vector<2x32xf32>
    %210 = arith.divf %208, %209 : vector<2x32xf32>
    %211 = vector.extract_strided_slice %202 {offsets = [0, 32], sizes = [2, 32], strides = [1, 1]} : vector<2x96xf32> to vector<2x32xf32>
    %212 = vector.extract_strided_slice %199 {offsets = [0, 32], sizes = [2, 32], strides = [1, 1]} : vector<2x96xf32> to vector<2x32xf32>
    %213 = arith.addf %211, %212 : vector<2x32xf32>
    %214 = arith.negf %213 : vector<2x32xf32>
    %215 = math.exp %214 : vector<2x32xf32>
    %cst_58 = arith.constant 1.000000e+00 : f32
    %216 = vector.broadcast %cst_58 : f32 to vector<2x32xf32>
    %217 = arith.addf %216, %215 : vector<2x32xf32>
    %218 = arith.divf %216, %217 : vector<2x32xf32>
    %219 = vector.extract_strided_slice %202 {offsets = [0, 64], sizes = [2, 32], strides = [1, 1]} : vector<2x96xf32> to vector<2x32xf32>
    %220 = vector.extract_strided_slice %199 {offsets = [0, 64], sizes = [2, 32], strides = [1, 1]} : vector<2x96xf32> to vector<2x32xf32>
    %221 = vector.broadcast %11 : vector<1x32xf32> to vector<2x32xf32>
    %222 = arith.addf %220, %221 : vector<2x32xf32>
    %223 = arith.mulf %210, %222 : vector<2x32xf32>
    %224 = arith.addf %219, %223 : vector<2x32xf32>
    %225 = math.tanh %224 : vector<2x32xf32>
    %cst_59 = arith.constant 1.000000e+00 : f32
    %226 = vector.broadcast %cst_59 : f32 to vector<2x32xf32>
    %227 = arith.subf %226, %218 : vector<2x32xf32>
    %228 = arith.mulf %227, %225 : vector<2x32xf32>
    %229 = arith.mulf %218, %193 : vector<2x32xf32>
    %230 = arith.addf %228, %229 : vector<2x32xf32>
    %231 = arith.index_cast %c5_i32 : i32 to index
    %c0_60 = arith.constant 0 : index
    %c0_61 = arith.constant 0 : index
    %232 = vector.load %arg6[%231, %c0_60, %c0_61] : memref<8x2x32xf32, #tpu.memory_space<vmem>>, vector<1x2x32xf32>
    %233 = vector.shape_cast %232 : vector<1x2x32xf32> to vector<2x32xf32>
    %234 = vector.shape_cast %230 : vector<2x32xf32> to vector<1x2x32xf32>
    tpu.vector_store %arg6[%231, %c0_60, %c0_61], %234 {strides = array<i32>} : memref<8x2x32xf32, #tpu.memory_space<vmem>>, vector<1x2x32xf32>,
    %c6_i32 = arith.constant 6 : i32
    %235 = arith.truncf %230 : vector<2x32xf32> to vector<2x32xbf16>
    %cst_62 = arith.constant dense<0.000000e+00> : vector<2x96xf32>
    %236 = tpu.matmul %235, %10, %cst_62 {dimension_numbers = #tpu.dot_dimension_numbers<[1], [0], [0], [1], [0, 0, 1, 1], [], []>} : vector<2x32xbf16>, vector<32x96xbf16>, vector<2x96xf32> -> vector<2x96xf32>
    %237 = arith.index_cast %c6_i32 : i32 to index
    %c0_63 = arith.constant 0 : index
    %c0_64 = arith.constant 0 : index
    %238 = vector.load %arg7[%237, %c0_63, %c0_64] : memref<8x2x96xf32, #tpu.memory_space<vmem>>, vector<1x2x96xf32>
    %239 = vector.shape_cast %238 : vector<1x2x96xf32> to vector<2x96xf32>
    %240 = vector.extract_strided_slice %239 {offsets = [0, 0], sizes = [2, 32], strides = [1, 1]} : vector<2x96xf32> to vector<2x32xf32>
    %241 = vector.extract_strided_slice %236 {offsets = [0, 0], sizes = [2, 32], strides = [1, 1]} : vector<2x96xf32> to vector<2x32xf32>
    %242 = arith.addf %240, %241 : vector<2x32xf32>
    %243 = arith.negf %242 : vector<2x32xf32>
    %244 = math.exp %243 : vector<2x32xf32>
    %cst_65 = arith.constant 1.000000e+00 : f32
    %245 = vector.broadcast %cst_65 : f32 to vector<2x32xf32>
    %246 = arith.addf %245, %244 : vector<2x32xf32>
    %247 = arith.divf %245, %246 : vector<2x32xf32>
    %248 = vector.extract_strided_slice %239 {offsets = [0, 32], sizes = [2, 32], strides = [1, 1]} : vector<2x96xf32> to vector<2x32xf32>
    %249 = vector.extract_strided_slice %236 {offsets = [0, 32], sizes = [2, 32], strides = [1, 1]} : vector<2x96xf32> to vector<2x32xf32>
    %250 = arith.addf %248, %249 : vector<2x32xf32>
    %251 = arith.negf %250 : vector<2x32xf32>
    %252 = math.exp %251 : vector<2x32xf32>
    %cst_66 = arith.constant 1.000000e+00 : f32
    %253 = vector.broadcast %cst_66 : f32 to vector<2x32xf32>
    %254 = arith.addf %253, %252 : vector<2x32xf32>
    %255 = arith.divf %253, %254 : vector<2x32xf32>
    %256 = vector.extract_strided_slice %239 {offsets = [0, 64], sizes = [2, 32], strides = [1, 1]} : vector<2x96xf32> to vector<2x32xf32>
    %257 = vector.extract_strided_slice %236 {offsets = [0, 64], sizes = [2, 32], strides = [1, 1]} : vector<2x96xf32> to vector<2x32xf32>
    %258 = vector.broadcast %11 : vector<1x32xf32> to vector<2x32xf32>
    %259 = arith.addf %257, %258 : vector<2x32xf32>
    %260 = arith.mulf %247, %259 : vector<2x32xf32>
    %261 = arith.addf %256, %260 : vector<2x32xf32>
    %262 = math.tanh %261 : vector<2x32xf32>
    %cst_67 = arith.constant 1.000000e+00 : f32
    %263 = vector.broadcast %cst_67 : f32 to vector<2x32xf32>
    %264 = arith.subf %263, %255 : vector<2x32xf32>
    %265 = arith.mulf %264, %262 : vector<2x32xf32>
    %266 = arith.mulf %255, %230 : vector<2x32xf32>
    %267 = arith.addf %265, %266 : vector<2x32xf32>
    %268 = arith.index_cast %c6_i32 : i32 to index
    %c0_68 = arith.constant 0 : index
    %c0_69 = arith.constant 0 : index
    %269 = vector.load %arg6[%268, %c0_68, %c0_69] : memref<8x2x32xf32, #tpu.memory_space<vmem>>, vector<1x2x32xf32>
    %270 = vector.shape_cast %269 : vector<1x2x32xf32> to vector<2x32xf32>
    %271 = vector.shape_cast %267 : vector<2x32xf32> to vector<1x2x32xf32>
    tpu.vector_store %arg6[%268, %c0_68, %c0_69], %271 {strides = array<i32>} : memref<8x2x32xf32, #tpu.memory_space<vmem>>, vector<1x2x32xf32>,
    %c7_i32 = arith.constant 7 : i32
    %272 = arith.truncf %267 : vector<2x32xf32> to vector<2x32xbf16>
    %cst_70 = arith.constant dense<0.000000e+00> : vector<2x96xf32>
    %273 = tpu.matmul %272, %10, %cst_70 {dimension_numbers = #tpu.dot_dimension_numbers<[1], [0], [0], [1], [0, 0, 1, 1], [], []>} : vector<2x32xbf16>, vector<32x96xbf16>, vector<2x96xf32> -> vector<2x96xf32>
    %274 = arith.index_cast %c7_i32 : i32 to index
    %c0_71 = arith.constant 0 : index
    %c0_72 = arith.constant 0 : index
    %275 = vector.load %arg7[%274, %c0_71, %c0_72] : memref<8x2x96xf32, #tpu.memory_space<vmem>>, vector<1x2x96xf32>
    %276 = vector.shape_cast %275 : vector<1x2x96xf32> to vector<2x96xf32>
    %277 = vector.extract_strided_slice %276 {offsets = [0, 0], sizes = [2, 32], strides = [1, 1]} : vector<2x96xf32> to vector<2x32xf32>
    %278 = vector.extract_strided_slice %273 {offsets = [0, 0], sizes = [2, 32], strides = [1, 1]} : vector<2x96xf32> to vector<2x32xf32>
    %279 = arith.addf %277, %278 : vector<2x32xf32>
    %280 = arith.negf %279 : vector<2x32xf32>
    %281 = math.exp %280 : vector<2x32xf32>
    %cst_73 = arith.constant 1.000000e+00 : f32
    %282 = vector.broadcast %cst_73 : f32 to vector<2x32xf32>
    %283 = arith.addf %282, %281 : vector<2x32xf32>
    %284 = arith.divf %282, %283 : vector<2x32xf32>
    %285 = vector.extract_strided_slice %276 {offsets = [0, 32], sizes = [2, 32], strides = [1, 1]} : vector<2x96xf32> to vector<2x32xf32>
    %286 = vector.extract_strided_slice %273 {offsets = [0, 32], sizes = [2, 32], strides = [1, 1]} : vector<2x96xf32> to vector<2x32xf32>
    %287 = arith.addf %285, %286 : vector<2x32xf32>
    %288 = arith.negf %287 : vector<2x32xf32>
    %289 = math.exp %288 : vector<2x32xf32>
    %cst_74 = arith.constant 1.000000e+00 : f32
    %290 = vector.broadcast %cst_74 : f32 to vector<2x32xf32>
    %291 = arith.addf %290, %289 : vector<2x32xf32>
    %292 = arith.divf %290, %291 : vector<2x32xf32>
    %293 = vector.extract_strided_slice %276 {offsets = [0, 64], sizes = [2, 32], strides = [1, 1]} : vector<2x96xf32> to vector<2x32xf32>
    %294 = vector.extract_strided_slice %273 {offsets = [0, 64], sizes = [2, 32], strides = [1, 1]} : vector<2x96xf32> to vector<2x32xf32>
    %295 = vector.broadcast %11 : vector<1x32xf32> to vector<2x32xf32>
    %296 = arith.addf %294, %295 : vector<2x32xf32>
    %297 = arith.mulf %284, %296 : vector<2x32xf32>
    %298 = arith.addf %293, %297 : vector<2x32xf32>
    %299 = math.tanh %298 : vector<2x32xf32>
    %cst_75 = arith.constant 1.000000e+00 : f32
    %300 = vector.broadcast %cst_75 : f32 to vector<2x32xf32>
    %301 = arith.subf %300, %292 : vector<2x32xf32>
    %302 = arith.mulf %301, %299 : vector<2x32xf32>
    %303 = arith.mulf %292, %267 : vector<2x32xf32>
    %304 = arith.addf %302, %303 : vector<2x32xf32>
    %305 = arith.index_cast %c7_i32 : i32 to index
    %c0_76 = arith.constant 0 : index
    %c0_77 = arith.constant 0 : index
    %306 = vector.load %arg6[%305, %c0_76, %c0_77] : memref<8x2x32xf32, #tpu.memory_space<vmem>>, vector<1x2x32xf32>
    %307 = vector.shape_cast %306 : vector<1x2x32xf32> to vector<2x32xf32>
    %308 = vector.shape_cast %304 : vector<2x32xf32> to vector<1x2x32xf32>
    tpu.vector_store %arg6[%305, %c0_76, %c0_77], %308 {strides = array<i32>} : memref<8x2x32xf32, #tpu.memory_space<vmem>>, vector<1x2x32xf32>,
    %c8_i32 = arith.constant 8 : i32
    return
  }
  func.func @transform_0(%arg0: i32) -> (i32, i32, i32) {
    %c0_i32 = arith.constant 0 : i32
    %c0_i32_0 = arith.constant 0 : i32
    %c0_i32_1 = arith.constant 0 : i32
    return %c0_i32, %arg0, %c0_i32_0 : i32, i32, i32
  }
  func.func @transform_1(%arg0: i32) -> (i32, i32) {
    %c0_i32 = arith.constant 0 : i32
    %c0_i32_0 = arith.constant 0 : i32
    %c0_i32_1 = arith.constant 0 : i32
    return %c0_i32, %c0_i32_0 : i32, i32
  }
  func.func @transform_2(%arg0: i32) -> (i32, i32) {
    %c0_i32 = arith.constant 0 : i32
    %c0_i32_0 = arith.constant 0 : i32
    %c0_i32_1 = arith.constant 0 : i32
    return %c0_i32, %c0_i32_0 : i32, i32
  }
  func.func @transform_3(%arg0: i32) -> (i32, i32) {
    %c0_i32 = arith.constant 0 : i32
    %c0_i32_0 = arith.constant 0 : i32
    %c0_i32_1 = arith.constant 0 : i32
    return %c0_i32, %c0_i32_0 : i32, i32
  }
  func.func @transform_4(%arg0: i32) -> (i32, i32) {
    %c0_i32 = arith.constant 0 : i32
    %c0_i32_0 = arith.constant 0 : i32
    %c0_i32_1 = arith.constant 0 : i32
    return %c0_i32, %c0_i32_0 : i32, i32
  }
  func.func @transform_5(%arg0: i32) -> (i32, i32, i32) {
    %c0_i32 = arith.constant 0 : i32
    %c0_i32_0 = arith.constant 0 : i32
    %c0_i32_1 = arith.constant 0 : i32
    return %c0_i32, %arg0, %c0_i32_0 : i32, i32, i32
  }
}

</mosaic_0001>

<bundles_post_ra>
// kernel: tpu_custom_call.1
= control target key start
LH: loop header
LB: loop body
LE: loop exit
PB: predicated region body
PF: predicated region fallthrough
CT: control target
= control target key end

     0   :  { %10 = vsyncpa [#allocation4], 0  ;;  %s1538_s0 = inlined_call_operand.hbm [shape: bf16[8,2,64], index: 0, kind: input, shape index: {}]   ;;  %s1539_s1 = inlined_call_operand.hbm [shape: bf16[64,96], index: 1, kind: input, shape index: {}]   ;;  %s1540_s2 = inlined_call_operand.hbm [shape: bf16[32,96], index: 2, kind: input, shape index: {}]   ;;  %s1541_s3 = inlined_call_operand.vmem [shape: f32[1,96], index: 3, kind: input, shape index: {}]   ;;  %s1542_s4 = inlined_call_operand.vmem [shape: f32[1,32], index: 4, kind: input, shape index: {}]   ;;  %s1543_s5 = inlined_call_operand.hbm [shape: f32[8,2,32], index: 5, kind: output, shape index: {}]  }
   0x1   :  { %11 = vsyncpa [#allocation7], 0 }
   0x2   :  { %12 = vsyncpa [#allocation5], 0  ;;  %s1261_s18 = smov [#allocation6]   ;;  %s1167_s22 = scalar_lea.hbm %s1539_s1, 512 }
   0x3   :  { %s30_s19 = sshll.u32 %s1261_s18, 4  ;;  %p1168_p0 = scmp.ne.s32.totalorder %s1539_s1, %s1167_s22  ;;  %s31_s19 = int_to_ptr.vmem [resolvable:$true] %s30_s19 }
   0x4   :  { %p1171_p1 = scmp.lt.u32.totalorder %s1167_s22, %s1539_s1 }
   0x6   :  { %p1173_p2 = pnand %p1171_p1, %p1168_p0 }
   0x8   :  { %1176 = shalt.err (!%p1173_p2)
}
   0x9   :  { %s1177_s27 = scalar_lea.vmem %s31_s19, 512  ;;  %p1182_p4 = scmp.lt.s32.totalorder %s31_s19, %s31_s19 }
   0xa   :  { %p1178_p3 = scmp.ne.s32.totalorder %s31_s19, %s1177_s27  ;;  %p1183_p5 = scmp.lt.s32.totalorder %s1177_s27, %s1177_s27 }
   0xc   :  { %p1184_p6 = por %p1183_p5, %p1182_p4 }
   0xe   :  { %p1185_p7 = pnand %p1184_p6, %p1178_p3 }
  0x10   :  { %1188 = shalt.err (!%p1185_p7)
}
  0x11   :  { %s1262_s28 = smov 64   ;;  %s1263_s29 = smov 4  }
  0x12   :  { %36 = dma.hbm_to_vmem [thread:$0]  %s1539_s1, 512, %s31_s19, [#allocation7], %s1262_s28, %s1262_s28, %s1263_s29  }
  0x13   :  { %s1264_s7 = smov [#allocation3]   ;;  %s1189_s11 = scalar_lea.hbm %s1538_s0, 128 }
  0x14   :  { %s18_s8 = sshll.u32 %s1264_s7, 4  ;;  %p1190_p8 = scmp.ne.s32.totalorder %s1538_s0, %s1189_s11  ;;  %s19_s8 = int_to_ptr.vmem [resolvable:$true] %s18_s8 }
  0x15   :  { %p1193_p9 = scmp.lt.u32.totalorder %s1189_s11, %s1538_s0 }
  0x17   :  { %p1195_p10 = pnand %p1193_p9, %p1190_p8 }
  0x19   :  { %1198 = shalt.err (!%p1195_p10)
}
  0x1a   :  { %s1199_s16 = scalar_lea.vmem %s19_s8, 128  ;;  %p1204_p12 = scmp.lt.s32.totalorder %s19_s8, %s19_s8 }
  0x1b   :  { %p1200_p11 = scmp.ne.s32.totalorder %s19_s8, %s1199_s16  ;;  %p1205_p13 = scmp.lt.s32.totalorder %s1199_s16, %s1199_s16 }
  0x1d   :  { %p1206_p0 = por %p1205_p13, %p1204_p12 }
  0x1f   :  { %p1207_p1 = pnand %p1206_p0, %p1200_p11 }
  0x21   :  { %1210 = shalt.err (!%p1207_p1)
}
  0x22   :  { %s1265_s1 = smov 16   ;;  %s1266_s17 = smov 1  }
  0x23   :  { %24 = dma.hbm_to_vmem [thread:$0]  %s1538_s0, 128, %s19_s8, [#allocation4], %s1265_s1, %s1265_s1, %s1266_s17  }
  0x24   :  { %s1267_s20 = smov [#allocation8]   ;;  %s1211_s24 = scalar_lea.hbm %s1540_s2, 256 }
  0x25   :  { %s42_s21 = sshll.u32 %s1267_s20, 4  ;;  %p1212_p2 = scmp.ne.s32.totalorder %s1540_s2, %s1211_s24  ;;  %s43_s21 = int_to_ptr.vmem [resolvable:$true] %s42_s21 }
  0x26   :  { %p1215_p3 = scmp.lt.u32.totalorder %s1211_s24, %s1540_s2 }
  0x28   :  { %p1217_p4 = pnand %p1215_p3, %p1212_p2 }
  0x2a   :  { %1220 = shalt.err (!%p1217_p4)
}
  0x2b   :  { %s1221_s6 = scalar_lea.vmem %s43_s21, 256  ;;  %p1226_p6 = scmp.lt.s32.totalorder %s43_s21, %s43_s21 }
  0x2c   :  { %p1222_p5 = scmp.ne.s32.totalorder %s43_s21, %s1221_s6  ;;  %p1227_p7 = scmp.lt.s32.totalorder %s1221_s6, %s1221_s6 }
  0x2e   :  { %p1228_p8 = por %p1227_p7, %p1226_p6 }
  0x30   :  { %p1229_p9 = pnand %p1228_p8, %p1222_p5 }
  0x32   :  { %1232 = shalt.err (!%p1229_p9)
}
  0x33   :  { %48 = dma.hbm_to_vmem [thread:$0]  %s1540_s2, 256, %s43_s21, [#allocation7], %s1262_s28, %s1262_s28, %s1263_s29  }
  0x34   :  { %1255 = dma.done.wait [#allocation4], 128  }
  0x35   :  { %1256 = vsyncadd [#allocation4], 4294967168 }
  0x36   :  { %1257 = dma.done.wait [#allocation7], 768  }
  0x37   :  { %1258 = vsyncadd [#allocation7], 4294966528  ;;  %v1268_v0 = vmov 0.0   ;;  %vm1269_vm0 = vmmov 0   ;;  %v1270_v1 = vmov 1966171168   ;;  %v94_v3 = vlaneseq }
  0x38   :  { %1021 = vmatprep.subr.bf16.mxu0 %v1268_v0  ;;  %1033 = vmatprep.subr.bf16.mxu1 %v1268_v0  ;;  %v92_v2 = vunpack.c.l.s4 %v1270_v1  ;;  %v1113_v4 = vld [vmem:[#allocation6] sm:$0xff]   ;;  %v1115_v8 = vld [vmem:[#allocation6 + $0x8] sm:$0xff]   ;;  %v1117_v10 = vld [vmem:[#allocation6 + $0x10] sm:$0xff]   ;;  %v1271_v26 = vmov 0   ;;  %vm160_vm1 = vcmask 523264   ;;  %vm264_vm2 = vcmask 779264  }
  0x39   :  { %1037 = vmatprep.mubr.msk.bf16.mxu1 %vm1269_vm0, %v1268_v0  ;;  %1029 = vmatprep.mubr.msk.bf16.mxu0 %vm1269_vm0, %v1268_v0  ;;  %v1355_v5 = vld [vmem:[#allocation8] sm:$0xff]   ;;  %v1357_v7 = vshrl.u32 %v94_v3, 7  ;;  %v1361_v9 = vld [vmem:[#allocation8 + $0x8] sm:$0xff]   ;;  %v63_v12 = vld [vmem:[#allocation3] sm:$0x1]  ;;  %vm290_vm3 = vcmask 261120  }
  0x3a   :  { %v93_v6 = vunpack.c.0.s8 %v92_v2  ;;  %1022 = vmatpush3.bf16.msra.mxu0 %v1113_v4  ;;  %1034 = vmatpush3.bf16.msra.mxu1 %v1355_v5  ;;  %v64_v13 = vld [vmem:[#allocation3 + $0x1] sm:$0x1]  ;;  %v65_v14 = vld [vmem:[#allocation3 + $0x2] sm:$0x1]  ;;  %v66_v15 = vld [vmem:[#allocation3 + $0x3] sm:$0x1] }
  0x3b   :  { %1023 = vmatprep.subr.bf16.mxu0 %v1268_v0  ;;  %1035 = vmatprep.subr.bf16.mxu1 %v1268_v0  ;;  %v67_v16 = vld [vmem:[#allocation3 + $0x4] sm:$0x1]  ;;  %v68_v17 = vld [vmem:[#allocation3 + $0x5] sm:$0x1]  ;;  %v87_v18 = vcombine.low %v63_v12, %v64_v13  ;;  %v69_v19 = vld [vmem:[#allocation3 + $0x6] sm:$0x1]  ;;  %v88_v21 = vcombine.low %v65_v14, %v66_v15 }
  0x3c   :  { %v96_v11 = vsub.s32 %v93_v6, %v1357_v7  ;;  %v70_v20 = vld [vmem:[#allocation3 + $0x7] sm:$0x1]  ;;  %v89_v22 = vcombine.low %v67_v16, %v68_v17  ;;  %v977_v23 = vld [vmem:[%s1542_s4] ss:$0 sm:$0xff]  ;;  %v1272_v37 = vmov 1983009808  }
  0x3d   :  { %v90_v24 = vcombine.low %v69_v19, %v70_v20  ;;  %347 = vrot.lane.b32.xlu0 %v977_v23, %s1262_s28  ;;  %v1118_v27 = vld [vmem:[#allocation6 + $0x18] sm:$0xff]   ;;  %v209_v38 = vunpack.c.l.s4 %v1272_v37  ;;  %v973_v47 = vld [vmem:[%s1541_s3] ss:$0 sm:$0xff]  ;;  %s1273_s3 = smov 96   ;;  %vm374_vm4 = vcmask 254976  }
  0x3e   :  { %1024 = vmatpush3.bf16.msra.mxu0 %v1115_v8  ;;  %1036 = vmatpush3.bf16.msra.mxu1 %v1361_v9  ;;  %v97_v25 = vrot.slane %v87_v18, %v96_v11  ;;  %v104_v28 = vrot.slane %v88_v21, %v96_v11  ;;  %v111_v29 = vrot.slane %v89_v22, %v96_v11 }
  0x3f   :  { %1025 = vmatprep.subr.bf16.mxu0 %v1268_v0  ;;  %1041 = vmatprep.subr.bf16.mxu1 %v1268_v0  ;;  %v118_v30 = vrot.slane %v90_v24, %v96_v11  ;;  %v210_v43 = vunpack.c.0.s8 %v209_v38 }
  0x40   :  { %v119_v31 = vcombine.low %v97_v25, %v104_v28 }
  0x41   :  { %1038 = vmatmul.mubr.bf16.vlgmr.msra.gmra.mrb[0].mxu1 %v1271_v26  ;;  %v120_v32 = vcombine.low %v111_v29, %v118_v30  ;;  %v213_v45 = vsub.s32 %v210_v43, %v1357_v7 }
  0x42   :  { %1026 = vmatpush3.bf16.msra.mxu0 %v1117_v10  ;;  %1042 = vmatpush3.bf16.msra.mxu1 %v1355_v5  ;;  %v127_v33 = vrot.slane %v119_v31, %v96_v11 }
  0x43   :  { %1027 = vmatprep.subr.bf16.mxu0 %v1268_v0  ;;  %1043 = vmatprep.subr.bf16.mxu1 %v1268_v0  ;;  %v134_v34 = vrot.slane %v120_v32, %v96_v11 }
  0x44   :  { %1045 = vmatprep.mubr.msk.bf16.mxu1 %vm1269_vm0, %v1268_v0 }
  0x45   :  { %v135_v35 = vcombine.low %v127_v33, %v134_v34 }
  0x46   :  { %1028 = vmatpush3.bf16.msra.mxu0 %v1118_v27  ;;  %1044 = vmatpush3.bf16.msra.mxu1 %v1361_v9 }
  0x47   :  { %1049 = vmatprep.subr.bf16.mxu0 %v1268_v0  ;;  %1057 = vmatprep.subr.bf16.mxu1 %v1268_v0 }
  0x49   :  { %1030 = vmatmul.mubr.msk.bf16.vlgmr.msra.gmra.mrb[0].mxu0 %vm160_vm1, %v135_v35 }
  0x4a   :  { %1050 = vmatpush3.bf16.msra.mxu0 %v1355_v5  ;;  %1053 = vmatprep.mubr.msk.bf16.mxu0 %vm1269_vm0, %v1268_v0 }
  0x4b   :  { %1051 = vmatprep.subr.bf16.mxu0 %v1268_v0 }
  0x4e   :  { %1052 = vmatpush3.bf16.msra.mxu0 %v1361_v9 }
  0x4f   :  { %1065 = vmatprep.subr.bf16.mxu0 %v1268_v0 }
  0xaf   :  { %v1386_v36 = vpop.permute.xlu0 %347 }
 0x114   :  { %v328_v39 = vpop.f32.mrb[0].mxu1 }
 0x115   :  { %v1039_v40 = vpop.f32.mrb[1].mxu1  ;;  %v350_v41 = vadd.f32 %v1386_v36, %v328_v39 }
 0x116   :  { %v331_v42 = vpop.f32.mrb[2].mxu1 }
 0x117   :  { %352 = vrot.lane.b32.xlu0 %v350_v41, %s1262_s28  ;;  %v1040_v44 = vpop.f32.mrb[3].mxu1 }
 0x11c   :  { %v198_v46 = vpop.f32.mrb[0].mxu0 }
 0x11d   :  { %v207_v48 = vcombine.high %v198_v46, %v198_v46  ;;  %v214_v49 = vrot.slane %v198_v46, %v213_v45  ;;  %v1031_v50 = vpop.f32.mrb[1].mxu0 }
 0x11e   :  { %v201_v51 = vpop.f32.mrb[2].mxu0 }
 0x11f   :  { %v221_v52 = vrot.slane %v207_v48, %v213_v45  ;;  %v222_v53 = vcombine.high %v214_v49, %v214_v49  ;;  %v256_v54 = vadd.f32 %v973_v47, %v214_v49  ;;  %v224_v55 = vcombine.high %v201_v51, %v201_v51  ;;  %v1032_v56 = vpop.f32.mrb[3].mxu0 }
 0x120   :  { %v231_v57 = vrot.slane %v201_v51, %v213_v45 }
 0x121   :  { %v223_v58 = vcombine.high %v221_v52, %v221_v52  ;;  %v257_v59 = vadd.f32 %v973_v47, %v222_v53  ;;  %v258_v60 = vadd.f32 %v973_v47, %v221_v52  ;;  %265 = vst.msk [vmem:[#allocation2] sm:$0x3] %vm264_vm2, %v256_v54  ;;  %v238_v61 = vrot.slane %v224_v55, %v213_v45 }
 0x122   :  { %v239_v62 = vcombine.high %v231_v57, %v231_v57  ;;  %v260_v63 = vadd.f32 %v973_v47, %v231_v57 }
 0x123   :  { %v259_v1 = vadd.f32 %v973_v47, %v223_v58  ;;  %266 = vst.msk [vmem:[#allocation2 + $0x2] sm:$0x3] %vm264_vm2, %v257_v59  ;;  %267 = vst.msk [vmem:[#allocation2 + $0x4] sm:$0x3] %vm264_vm2, %v258_v60  ;;  %v240_v2 = vcombine.high %v238_v61, %v238_v61  ;;  %v262_v3 = vadd.f32 %v973_v47, %v238_v61 }
 0x124   :  { %v261_v4 = vadd.f32 %v973_v47, %v239_v62  ;;  %269 = vst.msk [vmem:[#allocation2 + $0x8] sm:$0x3] %vm264_vm2, %v260_v63 }
 0x125   :  { %268 = vst.msk [vmem:[#allocation2 + $0x6] sm:$0x3] %vm264_vm2, %v259_v1  ;;  %v263_v6 = vadd.f32 %v973_v47, %v240_v2  ;;  %271 = vst.msk [vmem:[#allocation2 + $0xc] sm:$0x3] %vm264_vm2, %v262_v3 }
 0x126   :  { %270 = vst.msk [vmem:[#allocation2 + $0xa] sm:$0x3] %vm264_vm2, %v261_v4 }
 0x127   :  { %272 = vst.msk [vmem:[#allocation2 + $0xe] sm:$0x3] %vm264_vm2, %v263_v6 }
 0x128   :  { %v334_v7 = vld [vmem:[#allocation2] sm:$0x3] }
 0x129   :  { %v335_v8 = vadd.f32 %v334_v7, %v328_v39 }
 0x12a   :  { %v424_v31 = vld [vmem:[#allocation2 + $0x2] sm:$0x3]  ;;  %v506_v55 = vld [vmem:[#allocation2 + $0x4] sm:$0x3] }
 0x12b   :  { %v976_v10 = vmul.f32 -1.442695, %v335_v8 }
 0x12d   :  { %1119 = vpow2.f32 %v976_v10 }
 0x137   :  { %v1120_v11 = vpop.eup %1119 }
 0x138   :  { %v339_v12 = vadd.f32 1.0, %v1120_v11 }
 0x13a   :  { %1121 = vrcp.f32 %v339_v12 }
 0x144   :  { %v1122_v13 = vpop.eup %1121 }
 0x145   :  { %v362_v19 = vsub.f32 1.0, %v1122_v13  ;;  %v368_v21 = vmul.f32 0.0, %v1122_v13 }
 0x189   :  { %v353_v14 = vpop.permute.xlu0 %352 }
 0x18a   :  { %v355_v15 = vmul.f32 %v1122_v13, %v353_v14 }
 0x18c   :  { %357 = vrot.lane.b32.xlu1 %v355_v15, %s1262_s28 }
 0x1fe   :  { %v358_v16 = vpop.permute.xlu1 %357 }
 0x1ff   :  { %v360_v17 = vadd.f32 %v358_v16, %v334_v7 }
 0x201   :  { %1123 = vtanh.f32 %v360_v17  ;;  %v588_v17 = vld [vmem:[#allocation2 + $0x6] sm:$0x3] }
 0x20b   :  { %v1124_v18 = vpop.eup %1123 }
 0x20c   :  { %364 = vrot.lane.b32.xlu1 %v1124_v18, %s1273_s3 }
 0x27e   :  { %v365_v20 = vpop.permute.xlu1 %364 }
 0x27f   :  { %v367_v22 = vmul.f32 %v365_v20, %v362_v19 }
 0x281   :  { %v1404_v23 = vadd.f32 %v368_v21, %v367_v22 }
 0x283   :  { %v376_v24 = vpack.c.bf16 %v1404_v23, %v1404_v23 }
 0x285   :  { %378 = vrot.lane.b32.xlu0 %v376_v24, %s1273_s3 }
 0x2f7   :  { %v379_v25 = vpop.permute.xlu0 %378 }
 0x2f8   :  { %1046 = vmatmul.mubr.msk.bf16.vlgmr.msra.gmra.mrb[4].mxu1 %vm290_vm3, %v379_v25 }
 0x2f9   :  { %1058 = vmatpush3.bf16.msra.mxu1 %v1355_v5  ;;  %1061 = vmatprep.mubr.msk.bf16.mxu1 %vm1269_vm0, %v1268_v0 }
 0x2fa   :  { %1059 = vmatprep.subr.bf16.mxu1 %v1268_v0 }
 0x2fd   :  { %1060 = vmatpush3.bf16.msra.mxu1 %v1361_v9 }
 0x2fe   :  { %1073 = vmatprep.subr.bf16.mxu1 %v1268_v0 }
 0x3cb   :  { %v417_v26 = vpop.f32.mrb[4].mxu1 }
 0x3cc   :  { %v1047_v27 = vpop.f32.mrb[5].mxu1  ;;  %v432_v28 = vadd.f32 %v417_v26, %v1386_v36  ;;  %v425_v32 = vadd.f32 %v424_v31, %v417_v26 }
 0x3cd   :  { %v420_v29 = vpop.f32.mrb[6].mxu1 }
 0x3ce   :  { %434 = vrot.lane.b32.xlu1 %v432_v28, %s1262_s28  ;;  %v1048_v30 = vpop.f32.mrb[7].mxu1  ;;  %v979_v33 = vmul.f32 -1.442695, %v425_v32 }
 0x3d0   :  { %1125 = vpow2.f32 %v979_v33 }
 0x3da   :  { %v1126_v34 = vpop.eup %1125 }
 0x3db   :  { %v429_v35 = vadd.f32 1.0, %v1126_v34 }
 0x3dd   :  { %1127 = vrcp.f32 %v429_v35 }
 0x3e7   :  { %v1128_v37 = vpop.eup %1127 }
 0x3e8   :  { %v444_v43 = vsub.f32 1.0, %v1128_v37  ;;  %v450_v45 = vmul.f32 %v1128_v37, %v1404_v23 }
 0x440   :  { %v435_v38 = vpop.permute.xlu1 %434 }
 0x441   :  { %v437_v39 = vmul.f32 %v1128_v37, %v435_v38 }
 0x443   :  { %439 = vrot.lane.b32.xlu0 %v437_v39, %s1262_s28 }
 0x4b5   :  { %v440_v40 = vpop.permute.xlu0 %439 }
 0x4b6   :  { %v442_v41 = vadd.f32 %v440_v40, %v424_v31 }
 0x4b8   :  { %1129 = vtanh.f32 %v442_v41 }
 0x4c2   :  { %v1130_v42 = vpop.eup %1129 }
 0x4c3   :  { %446 = vrot.lane.b32.xlu1 %v1130_v42, %s1273_s3  ;;  %v670_v42 = vld [vmem:[#allocation2 + $0x8] sm:$0x3] }
 0x535   :  { %v447_v44 = vpop.permute.xlu1 %446 }
 0x536   :  { %v449_v46 = vmul.f32 %v447_v44, %v444_v43 }
 0x538   :  { %v1421_v47 = vadd.f32 %v450_v45, %v449_v46 }
 0x53a   :  { %v458_v48 = vpack.c.bf16 %v1421_v47, %v1421_v47 }
 0x53c   :  { %460 = vrot.lane.b32.xlu0 %v458_v48, %s1273_s3 }
 0x5ae   :  { %v461_v49 = vpop.permute.xlu0 %460 }
 0x5af   :  { %1054 = vmatmul.mubr.msk.bf16.vlgmr.msra.gmra.mrb[4].mxu0 %vm290_vm3, %v461_v49 }
 0x5b0   :  { %1066 = vmatpush3.bf16.msra.mxu0 %v1355_v5  ;;  %1069 = vmatprep.mubr.msk.bf16.mxu0 %vm1269_vm0, %v1268_v0 }
 0x5b1   :  { %1067 = vmatprep.subr.bf16.mxu0 %v1268_v0 }
 0x5b4   :  { %1068 = vmatpush3.bf16.msra.mxu0 %v1361_v9 }
 0x5b5   :  { %1081 = vmatprep.subr.bf16.mxu0 %v1268_v0 }
 0x682   :  { %v499_v50 = vpop.f32.mrb[4].mxu0 }
 0x683   :  { %v1055_v51 = vpop.f32.mrb[5].mxu0  ;;  %v514_v52 = vadd.f32 %v499_v50, %v1386_v36  ;;  %v507_v56 = vadd.f32 %v506_v55, %v499_v50 }
 0x684   :  { %v502_v53 = vpop.f32.mrb[6].mxu0 }
 0x685   :  { %516 = vrot.lane.b32.xlu1 %v514_v52, %s1262_s28  ;;  %v1056_v54 = vpop.f32.mrb[7].mxu0  ;;  %v981_v57 = vmul.f32 -1.442695, %v507_v56 }
 0x687   :  { %1131 = vpow2.f32 %v981_v57 }
 0x691   :  { %v1132_v58 = vpop.eup %1131 }
 0x692   :  { %v511_v59 = vadd.f32 1.0, %v1132_v58 }
 0x694   :  { %1133 = vrcp.f32 %v511_v59 }
 0x69e   :  { %v1134_v60 = vpop.eup %1133 }
 0x69f   :  { %v526_v3 = vsub.f32 1.0, %v1134_v60  ;;  %v532_v6 = vmul.f32 %v1134_v60, %v1421_v47 }
 0x6f7   :  { %v517_v61 = vpop.permute.xlu1 %516 }
 0x6f8   :  { %v519_v62 = vmul.f32 %v1134_v60, %v517_v61 }
 0x6fa   :  { %521 = vrot.lane.b32.xlu0 %v519_v62, %s1262_s28 }
 0x76c   :  { %v522_v63 = vpop.permute.xlu0 %521 }
 0x76d   :  { %v524_v1 = vadd.f32 %v522_v63, %v506_v55 }
 0x76f   :  { %1135 = vtanh.f32 %v524_v1 }
 0x779   :  { %v1136_v2 = vpop.eup %1135 }
 0x77a   :  { %528 = vrot.lane.b32.xlu1 %v1136_v2, %s1273_s3 }
 0x7ec   :  { %v529_v4 = vpop.permute.xlu1 %528 }
 0x7ed   :  { %v531_v7 = vmul.f32 %v529_v4, %v526_v3  ;;  %v752_v3 = vld [vmem:[#allocation2 + $0xa] sm:$0x3] }
 0x7ef   :  { %v1438_v8 = vadd.f32 %v532_v6, %v531_v7 }
 0x7f1   :  { %v540_v10 = vpack.c.bf16 %v1438_v8, %v1438_v8 }
 0x7f3   :  { %542 = vrot.lane.b32.xlu0 %v540_v10, %s1273_s3 }
 0x865   :  { %v543_v11 = vpop.permute.xlu0 %542 }
 0x866   :  { %1062 = vmatmul.mubr.msk.bf16.vlgmr.msra.gmra.mrb[8].mxu1 %vm290_vm3, %v543_v11 }
 0x867   :  { %1074 = vmatpush3.bf16.msra.mxu1 %v1355_v5  ;;  %1077 = vmatprep.mubr.msk.bf16.mxu1 %vm1269_vm0, %v1268_v0 }
 0x868   :  { %1075 = vmatprep.subr.bf16.mxu1 %v1268_v0 }
 0x86b   :  { %1076 = vmatpush3.bf16.msra.mxu1 %v1361_v9 }
 0x86c   :  { %1089 = vmatprep.subr.bf16.mxu1 %v1268_v0 }
 0x939   :  { %v581_v12 = vpop.f32.mrb[8].mxu1 }
 0x93a   :  { %v1063_v13 = vpop.f32.mrb[9].mxu1  ;;  %v596_v14 = vadd.f32 %v581_v12, %v1386_v36  ;;  %v589_v18 = vadd.f32 %v588_v17, %v581_v12 }
 0x93b   :  { %v584_v15 = vpop.f32.mrb[10].mxu1 }
 0x93c   :  { %598 = vrot.lane.b32.xlu1 %v596_v14, %s1262_s28  ;;  %v1064_v16 = vpop.f32.mrb[11].mxu1  ;;  %v983_v19 = vmul.f32 -1.442695, %v589_v18 }
 0x93e   :  { %1137 = vpow2.f32 %v983_v19 }
 0x948   :  { %v1138_v20 = vpop.eup %1137 }
 0x949   :  { %v593_v21 = vadd.f32 1.0, %v1138_v20 }
 0x94b   :  { %1139 = vrcp.f32 %v593_v21 }
 0x955   :  { %v1140_v22 = vpop.eup %1139 }
 0x956   :  { %v608_v29 = vsub.f32 1.0, %v1140_v22  ;;  %v614_v31 = vmul.f32 %v1140_v22, %v1438_v8 }
 0x9ae   :  { %v599_v24 = vpop.permute.xlu1 %598 }
 0x9af   :  { %v601_v25 = vmul.f32 %v1140_v22, %v599_v24 }
 0x9b1   :  { %603 = vrot.lane.b32.xlu0 %v601_v25, %s1262_s28 }
 0xa23   :  { %v604_v26 = vpop.permute.xlu0 %603 }
 0xa24   :  { %v606_v27 = vadd.f32 %v604_v26, %v588_v17 }
 0xa26   :  { %1141 = vtanh.f32 %v606_v27  ;;  %v834_v27 = vld [vmem:[#allocation2 + $0xc] sm:$0x3] }
 0xa30   :  { %v1142_v28 = vpop.eup %1141 }
 0xa31   :  { %610 = vrot.lane.b32.xlu1 %v1142_v28, %s1273_s3 }
 0xaa3   :  { %v611_v30 = vpop.permute.xlu1 %610 }
 0xaa4   :  { %v613_v32 = vmul.f32 %v611_v30, %v608_v29 }
 0xaa6   :  { %v1455_v33 = vadd.f32 %v614_v31, %v613_v32 }
 0xaa8   :  { %v622_v34 = vpack.c.bf16 %v1455_v33, %v1455_v33 }
 0xaaa   :  { %624 = vrot.lane.b32.xlu0 %v622_v34, %s1273_s3 }
 0xb1c   :  { %v625_v35 = vpop.permute.xlu0 %624 }
 0xb1d   :  { %1070 = vmatmul.mubr.msk.bf16.vlgmr.msra.gmra.mrb[8].mxu0 %vm290_vm3, %v625_v35 }
 0xb1e   :  { %1082 = vmatpush3.bf16.msra.mxu0 %v1355_v5  ;;  %1085 = vmatprep.mubr.msk.bf16.mxu0 %vm1269_vm0, %v1268_v0 }
 0xb1f   :  { %1083 = vmatprep.subr.bf16.mxu0 %v1268_v0 }
 0xb22   :  { %1084 = vmatpush3.bf16.msra.mxu0 %v1361_v9 }
 0xbf0   :  { %v663_v37 = vpop.f32.mrb[8].mxu0 }
 0xbf1   :  { %v1071_v38 = vpop.f32.mrb[9].mxu0  ;;  %v678_v39 = vadd.f32 %v663_v37, %v1386_v36  ;;  %v671_v43 = vadd.f32 %v670_v42, %v663_v37 }
 0xbf2   :  { %v666_v40 = vpop.f32.mrb[10].mxu0 }
 0xbf3   :  { %680 = vrot.lane.b32.xlu1 %v678_v39, %s1262_s28  ;;  %v1072_v41 = vpop.f32.mrb[11].mxu0  ;;  %v985_v44 = vmul.f32 -1.442695, %v671_v43 }
 0xbf5   :  { %1143 = vpow2.f32 %v985_v44 }
 0xbff   :  { %v1144_v45 = vpop.eup %1143 }
 0xc00   :  { %v675_v46 = vadd.f32 1.0, %v1144_v45 }
 0xc02   :  { %1145 = vrcp.f32 %v675_v46 }
 0xc0c   :  { %v1146_v48 = vpop.eup %1145 }
 0xc0d   :  { %v690_v54 = vsub.f32 1.0, %v1146_v48  ;;  %v696_v56 = vmul.f32 %v1146_v48, %v1455_v33 }
 0xc65   :  { %v681_v49 = vpop.permute.xlu1 %680 }
 0xc66   :  { %v683_v50 = vmul.f32 %v1146_v48, %v681_v49 }
 0xc68   :  { %685 = vrot.lane.b32.xlu0 %v683_v50, %s1262_s28 }
 0xcda   :  { %v686_v51 = vpop.permute.xlu0 %685 }
 0xcdb   :  { %v688_v52 = vadd.f32 %v686_v51, %v670_v42 }
 0xcdd   :  { %1147 = vtanh.f32 %v688_v52 }
 0xce7   :  { %v1148_v53 = vpop.eup %1147 }
 0xce8   :  { %692 = vrot.lane.b32.xlu1 %v1148_v53, %s1273_s3  ;;  %v916_v53 = vld [vmem:[#allocation2 + $0xe] sm:$0x3] }
 0xd5a   :  { %v693_v55 = vpop.permute.xlu1 %692 }
 0xd5b   :  { %v695_v57 = vmul.f32 %v693_v55, %v690_v54 }
 0xd5d   :  { %v1471_v58 = vadd.f32 %v696_v56, %v695_v57 }
 0xd5f   :  { %v704_v59 = vpack.c.bf16 %v1471_v58, %v1471_v58 }
 0xd61   :  { %706 = vrot.lane.b32.xlu0 %v704_v59, %s1273_s3 }
 0xdd3   :  { %v707_v60 = vpop.permute.xlu0 %706 }
 0xdd4   :  { %1078 = vmatmul.mubr.msk.bf16.vlgmr.msra.gmra.mrb[12].mxu1 %vm290_vm3, %v707_v60 }
 0xdd5   :  { %1090 = vmatpush3.bf16.msra.mxu1 %v1355_v5  ;;  %1093 = vmatprep.mubr.msk.bf16.mxu1 %vm1269_vm0, %v1268_v0 }
 0xdd6   :  { %1091 = vmatprep.subr.bf16.mxu1 %v1268_v0 }
 0xdd9   :  { %1092 = vmatpush3.bf16.msra.mxu1 %v1361_v9 }
 0xea7   :  { %v745_v61 = vpop.f32.mrb[12].mxu1 }
 0xea8   :  { %v1079_v62 = vpop.f32.mrb[13].mxu1  ;;  %v760_v63 = vadd.f32 %v745_v61, %v1386_v36  ;;  %v753_v4 = vadd.f32 %v752_v3, %v745_v61 }
 0xea9   :  { %v748_v1 = vpop.f32.mrb[14].mxu1 }
 0xeaa   :  { %762 = vrot.lane.b32.xlu1 %v760_v63, %s1262_s28  ;;  %v1080_v2 = vpop.f32.mrb[15].mxu1  ;;  %v987_v6 = vmul.f32 -1.442695, %v753_v4 }
 0xeac   :  { %1149 = vpow2.f32 %v987_v6 }
 0xeb6   :  { %v1150_v5 = vpop.eup %1149 }
 0xeb7   :  { %v757_v7 = vadd.f32 1.0, %v1150_v5 }
 0xeb9   :  { %1151 = vrcp.f32 %v757_v7 }
 0xec3   :  { %v1152_v10 = vpop.eup %1151 }
 0xec4   :  { %v772_v14 = vsub.f32 1.0, %v1152_v10  ;;  %v778_v16 = vmul.f32 %v1152_v10, %v1471_v58 }
 0xf1c   :  { %v763_v11 = vpop.permute.xlu1 %762 }
 0xf1d   :  { %v765_v0 = vmul.f32 %v1152_v10, %v763_v11 }
 0xf1f   :  { %767 = vrot.lane.b32.xlu0 %v765_v0, %s1262_s28 }
 0xf91   :  { %v768_v9 = vpop.permute.xlu0 %767 }
 0xf92   :  { %v770_v12 = vadd.f32 %v768_v9, %v752_v3 }
 0xf94   :  { %1153 = vtanh.f32 %v770_v12 }
 0xf9e   :  { %v1154_v13 = vpop.eup %1153 }
 0xf9f   :  { %774 = vrot.lane.b32.xlu1 %v1154_v13, %s1273_s3 }
0x1011   :  { %v775_v15 = vpop.permute.xlu1 %774 }
0x1012   :  { %v777_v17 = vmul.f32 %v775_v15, %v772_v14 }
0x1014   :  { %v1487_v18 = vadd.f32 %v778_v16, %v777_v17 }
0x1016   :  { %v786_v19 = vpack.c.bf16 %v1487_v18, %v1487_v18 }
0x1018   :  { %788 = vrot.lane.b32.xlu0 %v786_v19, %s1273_s3 }
0x108a   :  { %v789_v20 = vpop.permute.xlu0 %788 }
0x108b   :  { %1086 = vmatmul.mubr.msk.bf16.vlgmr.msra.gmra.mrb[12].mxu0 %vm290_vm3, %v789_v20 }
0x115e   :  { %v827_v21 = vpop.f32.mrb[12].mxu0 }
0x115f   :  { %v1087_v22 = vpop.f32.mrb[13].mxu0  ;;  %v842_v24 = vadd.f32 %v827_v21, %v1386_v36  ;;  %v835_v28 = vadd.f32 %v834_v27, %v827_v21 }
0x1160   :  { %v830_v25 = vpop.f32.mrb[14].mxu0 }
0x1161   :  { %844 = vrot.lane.b32.xlu1 %v842_v24, %s1262_s28  ;;  %v1088_v26 = vpop.f32.mrb[15].mxu0  ;;  %v989_v29 = vmul.f32 -1.442695, %v835_v28 }
0x1163   :  { %1155 = vpow2.f32 %v989_v29 }
0x116d   :  { %v1156_v30 = vpop.eup %1155 }
0x116e   :  { %v839_v31 = vadd.f32 1.0, %v1156_v30 }
0x1170   :  { %1157 = vrcp.f32 %v839_v31 }
0x117a   :  { %v1158_v32 = vpop.eup %1157 }
0x117b   :  { %v854_v40 = vsub.f32 1.0, %v1158_v32  ;;  %v860_v42 = vmul.f32 %v1158_v32, %v1487_v18 }
0x11d3   :  { %v845_v34 = vpop.permute.xlu1 %844 }
0x11d4   :  { %v847_v35 = vmul.f32 %v1158_v32, %v845_v34 }
0x11d6   :  { %849 = vrot.lane.b32.xlu0 %v847_v35, %s1262_s28 }
0x1248   :  { %v850_v37 = vpop.permute.xlu0 %849 }
0x1249   :  { %v852_v38 = vadd.f32 %v850_v37, %v834_v27 }
0x124b   :  { %1159 = vtanh.f32 %v852_v38 }
0x1255   :  { %v1160_v39 = vpop.eup %1159 }
0x1256   :  { %856 = vrot.lane.b32.xlu1 %v1160_v39, %s1273_s3 }
0x12c8   :  { %v857_v41 = vpop.permute.xlu1 %856 }
0x12c9   :  { %v859_v43 = vmul.f32 %v857_v41, %v854_v40 }
0x12cb   :  { %v861_v44 = vadd.f32 %v860_v42, %v859_v43 }
0x12cd   :  { %v868_v45 = vpack.c.bf16 %v861_v44, %v861_v44 }
0x12cf   :  { %870 = vrot.lane.b32.xlu0 %v868_v45, %s1273_s3 }
0x1341   :  { %v871_v46 = vpop.permute.xlu0 %870 }
0x1342   :  { %1094 = vmatmul.mubr.msk.bf16.vlgmr.msra.gmra.mrb[16].mxu1 %vm290_vm3, %v871_v46 }
0x1415   :  { %v909_v48 = vpop.f32.mrb[16].mxu1 }
0x1416   :  { %v1095_v49 = vpop.f32.mrb[17].mxu1  ;;  %v924_v50 = vadd.f32 %v909_v48, %v1386_v36  ;;  %v917_v54 = vadd.f32 %v916_v53, %v909_v48 }
0x1417   :  { %v912_v51 = vpop.f32.mrb[18].mxu1 }
0x1418   :  { %926 = vrot.lane.b32.xlu1 %v924_v50, %s1262_s28  ;;  %v1096_v52 = vpop.f32.mrb[19].mxu1  ;;  %v991_v55 = vmul.f32 -1.442695, %v917_v54 }
0x141a   :  { %1161 = vpow2.f32 %v991_v55 }
0x1424   :  { %v1162_v56 = vpop.eup %1161 }
0x1425   :  { %v921_v57 = vadd.f32 1.0, %v1162_v56 }
0x1427   :  { %1163 = vrcp.f32 %v921_v57 }
0x1431   :  { %v1164_v59 = vpop.eup %1163 }
0x1432   :  { %v942_v4 = vmul.f32 %v1164_v59, %v861_v44 }
0x148a   :  { %v927_v60 = vpop.permute.xlu1 %926 }
0x148b   :  { %v929_v61 = vmul.f32 %v1164_v59, %v927_v60 }
0x148d   :  { %931 = vrot.lane.b32.xlu0 %v929_v61, %s1262_s28  ;;  %s1274_s28 = smov [#allocation9]  }
0x148e   :  { %s955_s9 = sshll.u32 %s1274_s28, 4  ;;  %s956_s9 = int_to_ptr.vmem [resolvable:$true] %s955_s9 }
0x148f   :  { %s1233_s10 = scalar_lea.vmem %s956_s9, 256  ;;  %p1238_p11 = scmp.lt.s32.totalorder %s956_s9, %s956_s9 }
0x1490   :  { %p1234_p10 = scmp.ne.s32.totalorder %s956_s9, %s1233_s10  ;;  %p1239_p12 = scmp.lt.s32.totalorder %s1233_s10, %s1233_s10 }
0x1491   :  { %371 = vrot.lane.b32.xlu0 %v1404_v23, %s1273_s3 }
0x1492   :  { %p1240_p13 = por %p1239_p12, %p1238_p11 }
0x1494   :  { %p1241_p0 = pnand %p1240_p13, %p1234_p10 }
0x1495   :  { %535 = vrot.lane.b32.xlu0 %v1438_v8, %s1273_s3 }
0x1499   :  { %699 = vrot.lane.b32.xlu0 %v1471_v58, %s1273_s3  ;;  %v936_v58 = vsub.f32 1.0, %v1164_v59 }
0x149d   :  { %863 = vrot.lane.b32.xlu0 %v861_v44, %s1273_s3 }
0x14ff   :  { %v932_v36 = vpop.permute.xlu0 %931 }
0x1500   :  { %v934_v62 = vadd.f32 %v932_v36, %v916_v53 }
0x1502   :  { %1165 = vtanh.f32 %v934_v62 }
0x1503   :  { %v372_v63 = vpop.permute.xlu0 %371 }
0x1504   :  { %375 = vst.msk [vmem:[#allocation9] sm:$0x3] %vm374_vm4, %v372_v63 }
0x1507   :  { %v536_v1 = vpop.permute.xlu0 %535 }
0x1508   :  { %539 = vst.msk [vmem:[#allocation9 + $0x4] sm:$0x3] %vm374_vm4, %v536_v1 }
0x150b   :  { %v700_v2 = vpop.permute.xlu0 %699 }
0x150c   :  { %v1166_v23 = vpop.eup %1165  ;;  %703 = vst.msk [vmem:[#allocation9 + $0x8] sm:$0x3] %vm374_vm4, %v700_v2 }
0x150d   :  { %938 = vrot.lane.b32.xlu1 %v1166_v23, %s1273_s3 }
0x150f   :  { %v864_v8 = vpop.permute.xlu0 %863 }
0x1510   :  { %867 = vst.msk [vmem:[#allocation9 + $0xc] sm:$0x3] %vm374_vm4, %v864_v8 }
0x1511   :  { %453 = vrot.lane.b32.xlu1 %v1421_v47, %s1273_s3 }
0x1515   :  { %617 = vrot.lane.b32.xlu1 %v1455_v33, %s1273_s3 }
0x1519   :  { %781 = vrot.lane.b32.xlu1 %v1487_v18, %s1273_s3 }
0x157f   :  { %v939_v3 = vpop.permute.xlu1 %938 }
0x1580   :  { %v941_v6 = vmul.f32 %v939_v3, %v936_v58 }
0x1582   :  { %v943_v5 = vadd.f32 %v942_v4, %v941_v6 }
0x1583   :  { %v454_v7 = vpop.permute.xlu1 %453 }
0x1584   :  { %457 = vst.msk [vmem:[#allocation9 + $0x2] sm:$0x3] %vm374_vm4, %v454_v7  ;;  %945 = vrot.lane.b32.xlu1 %v943_v5, %s1273_s3 }
0x1587   :  { %v618_v10 = vpop.permute.xlu1 %617 }
0x1588   :  { %621 = vst.msk [vmem:[#allocation9 + $0x6] sm:$0x3] %vm374_vm4, %v618_v10 }
0x158b   :  { %v782_v47 = vpop.permute.xlu1 %781 }
0x158c   :  { %785 = vst.msk [vmem:[#allocation9 + $0xa] sm:$0x3] %vm374_vm4, %v782_v47 }
0x15f6   :  { %v946_v33 = vpop.permute.xlu1 %945 }
0x15f7   :  { %949 = vst.msk [vmem:[#allocation9 + $0xe] sm:$0x3] %vm374_vm4, %v946_v33 }
0x15f8   :  { %1244 = shalt.err (!%p1241_p0)
}
0x15f9   :  { %s1245_s13 = scalar_lea.hbm %s1543_s5, 256 }
0x15fa   :  { %p1246_p1 = scmp.ne.s32.totalorder %s1543_s5, %s1245_s13  ;;  %p1249_p2 = scmp.lt.u32.totalorder %s1245_s13, %s1543_s5 }
0x15fc   :  { %p1251_p3 = pnand %p1249_p2, %p1246_p1 }
0x15fe   :  { %1254 = shalt.err (!%p1251_p3)
}
0x15ff   :  { %s1275_s17 = smov 32   ;;  %s1276_s18 = smov 2  }
0x1600   :  { %961 = dma.vmem_to_hbm [thread:$0]  %s956_s9, 256, %s1543_s5, [#allocation5], %s1275_s17, %s1275_s17, %s1276_s18  }
0x1601   :  { %1259 = dma.done.wait [#allocation5], 256  }
0x1602   :  { %1260 = vsyncadd [#allocation5], 4294967040 }
0x1603   :  { %965 = vsyncpa [#allocation4], 1 }
0x1604   :  { %966 = vsyncpa [#allocation7], 1 }
0x1605   :  { %967 = vsyncpa [#allocation5], 1 }

</bundles_post_ra>
